<compile_context>
chip_gen: v7x
topology: tpu7x:2x2x1
jax: 0.10.0
libtpu: 0.0.40
codegen_flags: <defaults>
</compile_context>

<pallas_src>
import functools

import jax
import jax.numpy as jnp
import numpy as np
from jax import lax
from jax.experimental import pallas as pl
from jax.experimental.pallas import tpu as pltpu


# -----------------------------------------------------------------------------
# Device-dependent dtype defaults
# -----------------------------------------------------------------------------
def _device_kind():
    try:
        return jax.devices()[0].device_kind.lower()
    except Exception:
        return ""


def _bf16_elementwise_ok(kind):
    # v6e / v7x have bf16 VPU + EUP datapaths; v5e and earlier do not.
    return ("v6" in kind) or ("v7" in kind)


# -----------------------------------------------------------------------------
# Projection kernel: y = x @ W + b, batch folded into M for full MXU tiles.
# -----------------------------------------------------------------------------
def _linear_kernel(x_ref, w_ref, b_ref, o_ref):
    o_ref[...] = (jnp.dot(x_ref[...], w_ref[...],
                          preferred_element_type=jnp.float32)
                  + b_ref[...]).astype(o_ref.dtype)


def _linear(x2d, w, b, compute_dtype, out_dtype):
    M, K = x2d.shape
    H = w.shape[1]
    tm = M if M <= 512 else 512           # big MXU tiles; full M if small
    return pl.pallas_call(
        _linear_kernel,
        out_shape=jax.ShapeDtypeStruct((M, H), out_dtype),
        grid_spec=pltpu.PrefetchScalarGridSpec(
            num_scalar_prefetch=0,
            grid=(pl.cdiv(M, tm),),
            in_specs=[
                pl.BlockSpec((tm, K), lambda i: (i, 0)),
                pl.BlockSpec((K, H), lambda i: (0, 0)),
                pl.BlockSpec((1, H), lambda i: (0, 0)),
            ],
            out_specs=pl.BlockSpec((tm, H), lambda i: (i, 0)),
        ),
        compiler_params=pltpu.CompilerParams(
            dimension_semantics=("parallel",)),
    )(x2d.astype(compute_dtype), w.astype(compute_dtype),
      b.reshape(1, H).astype(jnp.float32))


# -----------------------------------------------------------------------------
# Attention kernel: one grid step == b_blk batch elements.
# -----------------------------------------------------------------------------
def _bahdanau_attn_kernel(qproj_ref, kproj_ref, mem_ref, mask_ref, wl_ref,
                          bl_ref, attn_ref, weights_ref, logits_scr,
                          *, m_chunk, q_chunk, m_len_real, ew_dtype):
    """Refs:
      qproj_ref:   (b, q_len, H)        query projection (bias included)
      kproj_ref:   (b, m_len_p, H)      key projection   (bias included)
      mem_ref:     (b, m_len_p, m_size) memory in its native dtype
      mask_ref:    (b, 1, m_len_p)      1.0 marks PAD positions
      wl_ref:      (1, H)               lane-major logit weight row
      bl_ref:      (1,)   SMEM          logit bias scalar
      attn_ref:    (b, q_len, m_size)   f32
      weights_ref: (b, q_len, m_len_p)  f32
      logits_scr:  (b, q_len, m_len_p)  f32 VMEM scratch (staging, not output)
    """
    q_len = qproj_ref.shape[1]
    m_len_p = kproj_ref.shape[1]
    n_m = m_len_p // m_chunk              # static
    n_q = q_len // q_chunk                # static

    wl = wl_ref[...].astype(ew_dtype)     # (1, H), lane-major
    bl = bl_ref[0]                        # scalar from SMEM

    # ---- logits: tanh(q + k) . wl, blocked so the broadcast stays small -----
    def compute_block(qs, ms):
        qp = qproj_ref[:, pl.ds(qs, q_chunk), :].astype(ew_dtype)   # (b,qc,H)
        kp = kproj_ref[:, pl.ds(ms, m_chunk), :].astype(ew_dtype)   # (b,mc,H)
        # (b, qc, mc, H): H stays on lanes, no transpose/relayout needed; the
        # lane reduction runs on XLU/VPU which have slack under the EUP tanh.
        t = jnp.tanh(qp[:, :, None, :] + kp[:, None, :, :])
        lg = jnp.sum(t * wl, axis=-1, dtype=jnp.float32) + bl       # (b,qc,mc)
        logits_scr[:, pl.ds(qs, q_chunk), pl.ds(ms, m_chunk)] = lg

    if n_m == 1 and n_q == 1:
        compute_block(0, 0)
    else:
        def body(i, carry):
            mi = i // n_q
            qi = i - mi * n_q
            compute_block(pl.multiple_of(qi * q_chunk, q_chunk),
                          pl.multiple_of(mi * m_chunk, m_chunk))
            return carry
        lax.fori_loop(0, n_m * n_q, body, 0, unroll=(n_m * n_q) <= 8)

    # ---- mask + softmax over m (f32) -----------------------------------------
    logits = logits_scr[...]                                  # (b,q_len,m_len_p)
    pad = mask_ref[...]                                       # (b,1,m_len_p)
    logits = jnp.where(pad > jnp.float32(0.5), jnp.float32(-1e18), logits)
    if m_len_real < m_len_p:
        # Padded columns get -inf so padded positions are exactly zero weight
        # even in the all-masked (uniform) degenerate case.
        col = lax.broadcasted_iota(jnp.int32, logits.shape, 2)
        logits = jnp.where(col >= m_len_real, -jnp.inf, logits)

    m_max = jnp.max(logits, axis=-1, keepdims=True)
    e = jnp.exp(logits - m_max)
    denom = jnp.sum(e, axis=-1, keepdims=True)
    approx = jnp.dtype(ew_dtype) == jnp.dtype(jnp.bfloat16)
    weights = e * pl.reciprocal(denom, approx=approx)         # (b,q_len,m_len_p)

    # ---- attns = weights @ memory (MXU, memory kept in its native dtype) ----
    mem = mem_ref[...]                                        # (b,m_len_p,m_size)
    attns = jnp.einsum("bqm,bmd->bqd", weights.astype(mem.dtype), mem,
                       preferred_element_type=jnp.float32)

    attn_ref[...] = attns.astype(attn_ref.dtype)
    weights_ref[...] = weights.astype(weights_ref.dtype)


# -----------------------------------------------------------------------------
# Block planning: lane-dense m chunks, register-sized tanh working set,
# multiple batch elements per grid step on the decode path.
# -----------------------------------------------------------------------------
def _plan_attention(B, q_len, m_len, hidden, m_size, ew_bytes, mem_bytes,
                    ew_budget=512 * 1024, vmem_budget=10 * 1024 * 1024):
    # Pad m to a lane-dense multiple of 128 once it exceeds one lane row.
    m_len_p = m_len if m_len <= 128 else ((m_len + 127) // 128) * 128

    # m_chunk: lane-dense slice of the memory axis.
    if m_len_p <= 128:
        m_chunk = m_len_p
    else:
        n128 = m_len_p // 128
        kmax = max(ew_budget // (128 * hidden * ew_bytes), 1)
        k = 1
        for d in range(1, n128 + 1):
            if n128 % d == 0 and d <= kmax:
                k = d
        m_chunk = 128 * k

    # q_chunk: bound the live (b, q_chunk, m_chunk, hidden) broadcast.
    per_q = m_chunk * hidden * ew_bytes
    qmax = max(ew_budget // per_q, 1)
    q_chunk = 1
    for d in range(1, q_len + 1):
        if q_len % d == 0 and d <= qmax:
            q_chunk = d

    # b_blk: batch elements per grid step (amortize ~0.35us/step on decode).
    per_b_ew = q_chunk * m_chunk * hidden * ew_bytes
    bmax_ew = max(ew_budget // max(per_b_ew, 1), 1)
    per_b_vmem = (2 * (q_len * hidden * ew_bytes           # qproj (x2 buffers)
                       + m_len_p * hidden * ew_bytes       # kproj
                       + m_len_p * m_size * mem_bytes      # memory
                       + m_len_p * 4                       # mask
                       + q_len * m_size * 4                # attns out
                       + q_len * m_len_p * 4)              # weights out
                  + q_len * m_len_p * 4)                   # logits scratch
    bmax_vm = max(vmem_budget // max(per_b_vmem, 1), 1)
    bmax = min(8, bmax_ew, bmax_vm, B)
    b_blk = 1
    for d in range(1, B + 1):
        if B % d == 0 and d <= bmax:
            b_blk = d
    return b_blk, q_chunk, m_chunk, m_len_p


# -----------------------------------------------------------------------------
# Public wrapper
# -----------------------------------------------------------------------------
def bahdanau_attention(query, memory, params, mask=None, cache=None,
                       compute_dtype=None, elementwise_dtype=None):
    """Pallas implementation of BahdanauAttention.forward.

    query:  [B, q_size] (one-step) or [B, q_len, q_size]
    memory: [B, m_len, m_size] (kept in its native dtype inside the kernel)
    mask:   optional [B, m_len]; truthy marks PAD positions
    cache:  optional precomputed linear_key(memory), [B, m_len, H]
    compute_dtype:     projection-matmul input dtype (default bf16, f32 accum)
    elementwise_dtype: add/tanh/reduce dtype (default bf16 on v6e/v7x, f32 else)
    returns (attns, weights), both f32
    """
    one_step = (query.ndim == 2)
    if one_step:
        query = query[:, None, :]

    B, q_len, q_size = query.shape
    _, m_len, m_size = memory.shape
    hidden = params["wq"].shape[1]

    kind = _device_kind()
    if compute_dtype is None:
        compute_dtype = jnp.bfloat16        # native MXU input on all generations
    if elementwise_dtype is None:
        elementwise_dtype = (jnp.bfloat16 if _bf16_elementwise_ok(kind)
                             else jnp.float32)

    ew_bytes = jnp.dtype(elementwise_dtype).itemsize
    mem_bytes = jnp.dtype(memory.dtype).itemsize
    b_blk, q_chunk, m_chunk, m_len_p = _plan_attention(
        B, q_len, m_len, hidden, m_size, ew_bytes, mem_bytes)

    # Projections with B folded into the matmul M dimension (full MXU tiles).
    qproj = _linear(query.reshape(B * q_len, q_size),
                    params["wq"], params["bq"], compute_dtype,
                    elementwise_dtype).reshape(B, q_len, hidden)
    if cache is not None:
        kproj = cache.reshape(B, m_len, hidden).astype(elementwise_dtype)
    else:
        kproj = _linear(memory.reshape(B * m_len, m_size),
                        params["wk"], params["bk"], compute_dtype,
                        elementwise_dtype).reshape(B, m_len, hidden)

    if mask is None:
        mask_f = jnp.zeros((B, 1, m_len_p), jnp.float32)
    else:
        mask_f = mask.astype(jnp.float32).reshape(B, 1, m_len)
        if m_len_p != m_len:
            mask_f = jnp.pad(mask_f, ((0, 0), (0, 0), (0, m_len_p - m_len)),
                             constant_values=1.0)

    memory_in = memory
    if m_len_p != m_len:
        kproj = jnp.pad(kproj, ((0, 0), (0, m_len_p - m_len), (0, 0)))
        memory_in = jnp.pad(memory, ((0, 0), (0, m_len_p - m_len), (0, 0)))

    wl_row = params["wl"].reshape(1, hidden).astype(elementwise_dtype)
    bl = params["bl"].reshape(1).astype(jnp.float32)      # SMEM scalar

    kernel = functools.partial(_bahdanau_attn_kernel, m_chunk=m_chunk,
                               q_chunk=q_chunk, m_len_real=m_len,
                               ew_dtype=elementwise_dtype)

    grid_spec = pltpu.PrefetchScalarGridSpec(
        num_scalar_prefetch=0,
        grid=(B // b_blk,),
        in_specs=[
            pl.BlockSpec((b_blk, q_len, hidden), lambda b: (b, 0, 0)),   # qproj
            pl.BlockSpec((b_blk, m_len_p, hidden), lambda b: (b, 0, 0)),  # kproj
            pl.BlockSpec((b_blk, m_len_p, m_size), lambda b: (b, 0, 0)),  # memory
            pl.BlockSpec((b_blk, 1, m_len_p), lambda b: (b, 0, 0)),       # mask
            pl.BlockSpec((1, hidden), lambda b: (0, 0)),                  # wl row
            pl.BlockSpec(memory_space=pltpu.MemorySpace.SMEM),            # bl
        ],
        out_specs=[
            pl.BlockSpec((b_blk, q_len, m_size), lambda b: (b, 0, 0)),    # attns
            pl.BlockSpec((b_blk, q_len, m_len_p), lambda b: (b, 0, 0)),   # weights
        ],
        scratch_shapes=[pltpu.VMEM((b_blk, q_len, m_len_p), jnp.float32)],
    )

    attns, weights = pl.pallas_call(
        kernel,
        out_shape=(
            jax.ShapeDtypeStruct((B, q_len, m_size), jnp.float32),
            jax.ShapeDtypeStruct((B, q_len, m_len_p), jnp.float32),
        ),
        grid_spec=grid_spec,
        compiler_params=pltpu.CompilerParams(
            dimension_semantics=("parallel",)),
    )(qproj, kproj, memory_in, mask_f, wl_row, bl)

    if m_len_p != m_len:
        weights = weights[:, :, :m_len]
    if one_step:
        attns = attns[:, 0, :]
    return attns, weights


# -----------------------------------------------------------------------------
# Pure-JAX reference matching the PyTorch forward.
# -----------------------------------------------------------------------------
def _reference(query, memory, params, mask=None):
    one_step = (query.ndim == 2)
    if one_step:
        query = query[:, None, :]
    q = query @ params["wq"] + params["bq"]                       # (B, q_len, H)
    k = memory @ params["wk"] + params["bk"]                      # (B, m_len, H)
    t = jnp.tanh(q[:, :, None, :] + k[:, None, :, :])             # (B, q, m, H)
    logits = jnp.einsum("bqmh,h->bqm", t, params["wl"]) + params["bl"]
    if mask is not None:
        logits = jnp.where(mask[:, None, :], -1e18, logits)
    weights = jax.nn.softmax(logits, axis=-1)
    attns = jnp.einsum("bqm,bmd->bqd", weights, memory)
    if one_step:
        attns = attns[:, 0, :]
    return attns, weights


if __name__ == "__main__":
    B, q_len, m_len = 2, 8, 8
    query_size, key_size = 32, 32
    hidden = key_size  # hidden_size defaults to key_size

    key = jax.random.PRNGKey(0)
    kq, km, kmask, k1, k2, k3, k4, k5, k6 = jax.random.split(key, 9)

    query3 = jax.random.normal(kq, (B, q_len, query_size), jnp.float32)
    memory = jax.random.normal(km, (B, m_len, key_size), jnp.float32)
    mask = jax.random.bernoulli(kmask, 0.25, (B, m_len))

    def uinit(k, shape, fan):
        bound = 1.0 / np.sqrt(fan)
        return jax.random.uniform(k, shape, jnp.float32, -bound, bound)

    params = {
        "wq": uinit(k1, (query_size, hidden), query_size),
        "bq": uinit(k2, (hidden,), query_size),
        "wk": uinit(k3, (key_size, hidden), key_size),
        "bk": uinit(k4, (hidden,), key_size),
        "wl": uinit(k5, (hidden,), hidden),
        "bl": uinit(k6, (1,), hidden),
    }

    f32 = dict(compute_dtype=jnp.float32, elementwise_dtype=jnp.float32)
    ref_attns, ref_weights = _reference(query3, memory, params, mask=mask)

    # 3-D query path with mask (f32 path, tight tolerance).
    attns, weights = bahdanau_attention(query3, memory, params, mask=mask, **f32)
    jax.block_until_ready((attns, weights))
    np.testing.assert_allclose(np.asarray(attns), np.asarray(ref_attns),
                               rtol=1e-4, atol=1e-4)
    np.testing.assert_allclose(np.asarray(weights), np.asarray(ref_weights),
                               rtol=1e-4, atol=1e-4)

    # 2-D query path (one_step=True, no mask).
    query2 = query3[:, 0, :]
    attns2, weights2 = bahdanau_attention(query2, memory, params, **f32)
    jax.block_until_ready((attns2, weights2))
    ref_attns2, ref_weights2 = _reference(query2, memory, params)
    np.testing.assert_allclose(np.asarray(attns2), np.asarray(ref_attns2),
                               rtol=1e-4, atol=1e-4)
    np.testing.assert_allclose(np.asarray(weights2), np.asarray(ref_weights2),
                               rtol=1e-4, atol=1e-4)

    # Precomputed key-projection cache path (compute_cache equivalent).
    cache = (memory.reshape(-1, key_size) @ params["wk"]
             + params["bk"]).reshape(B, m_len, hidden)
    attns3, weights3 = bahdanau_attention(query3, memory, params,
                                          mask=mask, cache=cache, **f32)
    jax.block_until_ready((attns3, weights3))
    np.testing.assert_allclose(np.asarray(attns3), np.asarray(ref_attns),
                               rtol=1e-4, atol=1e-4)
    np.testing.assert_allclose(np.asarray(weights3), np.asarray(ref_weights),
                               rtol=1e-4, atol=1e-4)

    # Default (auto dtypes) path: bf16 projections everywhere, bf16 tanh on
    # v6e/v7x, bf16 memory for the weights@memory matmul — loose tolerance.
    attns4, weights4 = bahdanau_attention(query3, memory.astype(jnp.bfloat16),
                                          params, mask=mask)
    jax.block_until_ready((attns4, weights4))
    np.testing.assert_allclose(np.asarray(attns4), np.asarray(ref_attns),
                               rtol=5e-2, atol=5e-2)
    np.testing.assert_allclose(np.asarray(weights4), np.asarray(ref_weights),
                               rtol=5e-2, atol=5e-2)

    print("KERNEL_OK")
</pallas_src>

<mosaic_0001>
module attributes {stable_mosaic.version = 11 : i64} {
  func.func @_linear_kernel(%arg0: i32, %arg1: memref<16x32xf32, #tpu.memory_space<vmem>>, %arg2: memref<32x32xf32, #tpu.memory_space<vmem>>, %arg3: memref<1x32xf32, #tpu.memory_space<vmem>>, %arg4: memref<16x32xf32, #tpu.memory_space<vmem>>) attributes {dimension_semantics = [#tpu.dimension_semantics<parallel>], iteration_bounds = array<i64: 1>, scalar_prefetch = 0 : i64, scratch_operands = 0 : i64, tpu.core_type = #tpu.core_type<tc>, window_params = [{transform_indices = @transform_0, window_bounds = array<i64: 16, 32>}, {pipeline_mode = #tpu.pipeline_mode<synchronous>, transform_indices = @transform_1, window_bounds = array<i64: 32, 32>}, {pipeline_mode = #tpu.pipeline_mode<synchronous>, transform_indices = @transform_2, window_bounds = array<i64: 1, 32>}, {transform_indices = @transform_3, window_bounds = array<i64: 16, 32>}]} {
    %c0 = arith.constant 0 : index
    %c0_0 = arith.constant 0 : index
    %0 = vector.load %arg1[%c0, %c0_0] : memref<16x32xf32, #tpu.memory_space<vmem>>, vector<16x32xf32>
    %c0_1 = arith.constant 0 : index
    %c0_2 = arith.constant 0 : index
    %1 = vector.load %arg2[%c0_1, %c0_2] : memref<32x32xf32, #tpu.memory_space<vmem>>, vector<32x32xf32>
    %cst = arith.constant dense<0.000000e+00> : vector<16x32xf32>
    %2 = tpu.matmul %0, %1, %cst {dimension_numbers = #tpu.dot_dimension_numbers<[1], [0], [0], [1], [0, 0, 1, 1], [], []>} : vector<16x32xf32>, vector<32x32xf32>, vector<16x32xf32> -> vector<16x32xf32>
    %c0_3 = arith.constant 0 : index
    %c0_4 = arith.constant 0 : index
    %3 = vector.load %arg3[%c0_3, %c0_4] : memref<1x32xf32, #tpu.memory_space<vmem>>, vector<1x32xf32>
    %4 = vector.broadcast %3 : vector<1x32xf32> to vector<16x32xf32>
    %5 = arith.addf %2, %4 : vector<16x32xf32>
    %c0_5 = arith.constant 0 : index
    %c0_6 = arith.constant 0 : index
    %6 = vector.load %arg4[%c0_5, %c0_6] : memref<16x32xf32, #tpu.memory_space<vmem>>, vector<16x32xf32>
    tpu.vector_store %arg4[%c0_5, %c0_6], %5 {strides = array<i32>} : memref<16x32xf32, #tpu.memory_space<vmem>>, vector<16x32xf32>,
    return
  }
  func.func @transform_0(%arg0: i32) -> (i32, i32) {
    %c0_i32 = arith.constant 0 : i32
    %c0_i32_0 = arith.constant 0 : i32
    return %arg0, %c0_i32 : i32, i32
  }
  func.func @transform_1(%arg0: i32) -> (i32, i32) {
    %c0_i32 = arith.constant 0 : i32
    %c0_i32_0 = arith.constant 0 : i32
    %c0_i32_1 = arith.constant 0 : i32
    return %c0_i32, %c0_i32_0 : i32, i32
  }
  func.func @transform_2(%arg0: i32) -> (i32, i32) {
    %c0_i32 = arith.constant 0 : i32
    %c0_i32_0 = arith.constant 0 : i32
    %c0_i32_1 = arith.constant 0 : i32
    return %c0_i32, %c0_i32_0 : i32, i32
  }
  func.func @transform_3(%arg0: i32) -> (i32, i32) {
    %c0_i32 = arith.constant 0 : i32
    %c0_i32_0 = arith.constant 0 : i32
    return %arg0, %c0_i32 : i32, i32
  }
}

</mosaic_0001>

<bundles_post_ra>
// kernel: tpu_custom_call.1
= control target key start
LH: loop header
LB: loop body
LE: loop exit
PB: predicated region body
PF: predicated region fallthrough
CT: control target
= control target key end

     0   :  { %8 = vsyncpa [#allocation3], 0  ;;  %s340_s0 = inlined_call_operand.hbm [shape: f32[16,32], index: 0, kind: input, shape index: {}]   ;;  %s341_s1 = inlined_call_operand.hbm [shape: f32[32,32], index: 1, kind: input, shape index: {}]   ;;  %s342_s2 = inlined_call_operand.vmem [shape: f32[1,32], index: 2, kind: input, shape index: {}]   ;;  %s343_s3 = inlined_call_operand.hbm [shape: f32[16,32], index: 3, kind: output, shape index: {}]  }
   0x1   :  { %9 = vsyncpa [#allocation6], 0 }
   0x2   :  { %10 = vsyncpa [#allocation4], 0  ;;  %s263_s12 = smov [#allocation2]   ;;  %s191_s16 = scalar_lea.hbm %s340_s0, 256 }
   0x3   :  { %s16_s13 = sshll.u32 %s263_s12, 4  ;;  %p192_p0 = scmp.ne.s32.totalorder %s340_s0, %s191_s16  ;;  %s17_s13 = int_to_ptr.vmem [resolvable:$true] %s16_s13 }
   0x4   :  { %p195_p1 = scmp.lt.u32.totalorder %s191_s16, %s340_s0 }
   0x6   :  { %p197_p2 = pnand %p195_p1, %p192_p0 }
   0x8   :  { %200 = shalt.err (!%p197_p2)
}
   0x9   :  { %s201_s21 = scalar_lea.vmem %s17_s13, 256  ;;  %p206_p4 = scmp.lt.s32.totalorder %s17_s13, %s17_s13 }
   0xa   :  { %p202_p3 = scmp.ne.s32.totalorder %s17_s13, %s201_s21  ;;  %p207_p5 = scmp.lt.s32.totalorder %s201_s21, %s201_s21 }
   0xc   :  { %p208_p6 = por %p207_p5, %p206_p4 }
   0xe   :  { %p209_p7 = pnand %p208_p6, %p202_p3 }
  0x10   :  { %212 = shalt.err (!%p209_p7)
}
  0x11   :  { %s264_s22 = smov 128   ;;  %s265_s23 = smov 8  }
  0x12   :  { %22 = dma.hbm_to_vmem [thread:$0]  %s340_s0, 256, %s17_s13, [#allocation3], %s264_s22, %s264_s22, %s265_s23  }
  0x13   :  { %s266_s26 = smov [#allocation5]   ;;  %s213_s30 = scalar_lea.hbm %s341_s1, 512 }
  0x14   :  { %s28_s27 = sshll.u32 %s266_s26, 4  ;;  %p214_p8 = scmp.ne.s32.totalorder %s341_s1, %s213_s30  ;;  %s29_s27 = int_to_ptr.vmem [resolvable:$true] %s28_s27 }
  0x15   :  { %p217_p9 = scmp.lt.u32.totalorder %s213_s30, %s341_s1 }
  0x17   :  { %p219_p10 = pnand %p217_p9, %p214_p8 }
  0x19   :  { %222 = shalt.err (!%p219_p10)
}
  0x1a   :  { %s223_s8 = scalar_lea.vmem %s29_s27, 512  ;;  %p228_p12 = scmp.lt.s32.totalorder %s29_s27, %s29_s27 }
  0x1b   :  { %p224_p11 = scmp.ne.s32.totalorder %s29_s27, %s223_s8  ;;  %p229_p13 = scmp.lt.s32.totalorder %s223_s8, %s223_s8 }
  0x1d   :  { %p230_p0 = por %p229_p13, %p228_p12 }
  0x1f   :  { %p231_p1 = pnand %p230_p0, %p224_p11 }
  0x21   :  { %234 = shalt.err (!%p231_p1)
}
  0x22   :  { %34 = dma.hbm_to_vmem [thread:$0]  %s341_s1, 512, %s29_s27, [#allocation6], %s264_s22, %s264_s22, %s265_s23  }
  0x23   :  { %257 = dma.done.wait [#allocation3], 256  }
  0x24   :  { %258 = vsyncadd [#allocation3], 4294967040 }
  0x25   :  { %259 = dma.done.wait [#allocation6], 512  }
  0x26   :  { %260 = vsyncadd [#allocation6], 4294966784  ;;  %vm56_vm0 = vcmask 261120   ;;  %v45_v0 = vld [vmem:[#allocation5] sm:$0xff]  ;;  %v46_v1 = vld [vmem:[#allocation5 + $0x8] sm:$0xff]  ;;  %s267_s11 = smov [#allocation7]  }
  0x27   :  { %v47_v2 = vld [vmem:[#allocation5 + $0x10] sm:$0xff]  ;;  %v178_v3 = vpack.c.bf16 %v46_v1, %v45_v0  ;;  %v48_v4 = vld [vmem:[#allocation5 + $0x18] sm:$0xff]  ;;  %s145_s12 = sshll.u32 %s267_s11, 4  ;;  %s146_s12 = int_to_ptr.vmem [resolvable:$true] %s145_s12 }
  0x28   :  { %v43_v5 = vld [vmem:[#allocation2] sm:$0xff]  ;;  %v182_v6 = vpack.c.bf16 %v48_v4, %v47_v2  ;;  %v44_v7 = vld [vmem:[#allocation2 + $0x8] sm:$0xff]  ;;  %s235_s13 = scalar_lea.vmem %s146_s12, 256  ;;  %p240_p3 = scmp.lt.s32.totalorder %s146_s12, %s146_s12 }
  0x29   :  { %175 = vmatprep.mubr.msk.f32.mxu0 %vm56_vm0, %v43_v5  ;;  %179 = vmatprep.subr.bf16.mxu0 %v178_v3  ;;  %v158_v8 = vld [vmem:[%s342_s2] ss:$0 sm:$0xff]  ;;  %p236_p2 = scmp.ne.s32.totalorder %s146_s12, %s235_s13  ;;  %p241_p4 = scmp.lt.s32.totalorder %s235_s13, %s235_s13 }
  0x2a   :  { %181 = vmatpush3.bf16.msra.mxu0 %v178_v3 }
  0x2b   :  { %183 = vmatprep.subr.bf16.mxu0 %v182_v6  ;;  %p242_p5 = por %p241_p4, %p240_p3 }
  0x2d   :  { %p243_p6 = pnand %p242_p5, %p236_p2 }
  0x2e   :  { %185 = vmatpush3.bf16.msra.mxu0 %v182_v6 }
  0x31   :  { %176 = vmatmul.mubr.msk.f32.vlgmr.msra.gmra.mrb[0].mxu0 %vm56_vm0, %v44_v7 }
 0x104   :  { %v177_v9 = vpop.f32.mrb[0].mxu0 }
 0x105   :  { %v135_v10 = vadd.f32 %v177_v9, %v158_v8  ;;  %v129_v11 = vpop.f32.mrb[1].mxu0 }
 0x106   :  { %v130_v12 = vadd.f32 %v158_v8, %v129_v11 }
 0x107   :  { %139 = vst.msk [vmem:[#allocation7 + $0x8] sm:$0xff] %vm56_vm0, %v135_v10 }
 0x108   :  { %138 = vst.msk [vmem:[#allocation7] sm:$0xff] %vm56_vm0, %v130_v12 }
 0x109   :  { %246 = shalt.err (!%p243_p6)
}
 0x10a   :  { %s247_s15 = scalar_lea.hbm %s343_s3, 256 }
 0x10b   :  { %p248_p7 = scmp.ne.s32.totalorder %s343_s3, %s247_s15  ;;  %p251_p8 = scmp.lt.u32.totalorder %s247_s15, %s343_s3 }
 0x10d   :  { %p253_p9 = pnand %p251_p8, %p248_p7 }
 0x10f   :  { %256 = shalt.err (!%p253_p9)
}
 0x110   :  { %151 = dma.vmem_to_hbm [thread:$0]  %s146_s12, 256, %s343_s3, [#allocation4], %s264_s22, %s264_s22, %s265_s23  }
 0x111   :  { %261 = dma.done.wait [#allocation4], 256  }
 0x112   :  { %262 = vsyncadd [#allocation4], 4294967040 }
 0x113   :  { %155 = vsyncpa [#allocation3], 1 }
 0x114   :  { %156 = vsyncpa [#allocation6], 1 }
 0x115   :  { %157 = vsyncpa [#allocation4], 1 }

</bundles_post_ra>
